<compile_context>
chip_gen: v7x
topology: tpu7x:2x2x1
jax: 0.10.0
libtpu: 0.0.40
codegen_flags: <defaults>
</compile_context>

<pallas_src>
import functools

import numpy as np

import jax
import jax.numpy as jnp
from jax import lax
from jax.experimental import pallas as pl
from jax.experimental.pallas import tpu as pltpu

LANE = 128
SUBLANE = 8
VMEM_LIMIT_BYTES = 32 * 1024 * 1024    # explicit scoped-VMEM limit (safe on v5e/v6e/v7x)
INPUT_VMEM_BUDGET = 20 * 1024 * 1024   # double-buffered input tiles must fit in this
MAX_TILE_ROWS = 8192                   # hard cap on rows per streamed tile (4 MiB f32)


def _round_up(x, m):
    return ((x + m - 1) // m) * m


def _num_tensorcores():
    """2 on multi-TensorCore chips (v7x), 1 on single-TC chips (v5e/v6e).

    On 1-TC chips a 2-way core split is pure overhead (duplicate accumulator
    slab, phantom clamped block, forced tail mask), so default to 1.
    """
    try:
        kind = jax.devices()[0].device_kind.lower()
    except Exception:
        return 1
    return 2 if "v7" in kind else 1


def _loss_stats_kernel(*refs, maxdisp, rows_valid, tile_rows, steps_per_core,
                       compute_d1, apply_tail_mask):
    """Per-(core, step) partial reduction.

    refs = (*pred_refs, gt_ref, out_ref)
      pred_refs[p] : (tile_rows, 128) prediction tile (any float dtype, upcast here)
      gt_ref       : (tile_rows, 128) gt tile — streamed once, shared by all preds
      out_ref      : (1, P, 3, 8, 128) f32 per-core accumulator slab, resident
                     across the inner ("arbitrary") grid axis.
                     slot 0 = masked count, 1 = smooth-L1 sum, 2 = D1 hit count.
    """
    *pred_refs, gt_ref, out_ref = refs
    num_preds = len(pred_refs)
    s = pl.program_id(1)

    @pl.when(s == 0)
    def _():
        out_ref[...] = jnp.zeros_like(out_ref)

    gt = gt_ref[...].astype(jnp.float32)
    # Same mask as torch: (gt > 0) & (gt < maxdisp).  Lane/row zero-padding has
    # gt == 0 and is excluded here; only garbage rows of a ragged last block and
    # phantom (clamped) blocks need the explicit row mask below.
    base_mask = (gt > 0.0) & (gt < maxdisp)
    gt_abs_scaled = 0.05 * jnp.abs(gt) if compute_d1 else None

    def fold(q):
        # (tile_rows, 128) -> (8, 128): sublane-aligned fold, pure vreg adds
        # (no per-step cross-sublane XLU reduce, no masked sub-tile stores).
        return q.reshape(tile_rows // SUBLANE, SUBLANE, LANE).sum(axis=0)

    def accumulate(mask):
        cnt_fold = fold(mask.astype(jnp.float32))   # prediction-independent
        for p in range(num_preds):
            pred = pred_refs[p][...].astype(jnp.float32)
            d = pred - gt
            ad = jnp.abs(d)
            # F.smooth_l1_loss with default beta = 1.0
            sl1 = jnp.where(ad < 1.0, 0.5 * d * d, ad - 0.5)
            out_ref[0, p, 0] += cnt_fold
            out_ref[0, p, 1] += fold(jnp.where(mask, sl1, 0.0))
            if compute_d1:
                # D1: (|E| > 3) & (|E|/|gt| > 0.05); divide-free form, equivalent
                # under the gt > 0 mask, which stays ANDed in.
                d1_hit = mask & (ad > 3.0) & (ad > gt_abs_scaled)
                out_ref[0, p, 2] += fold(d1_hit.astype(jnp.float32))

    if apply_tail_mask:
        c = pl.program_id(0)
        blk = c * steps_per_core + s          # logical (un-clamped) block index
        base_row = blk * tile_rows
        is_tail = (base_row + tile_rows) > rows_valid

        # Interior blocks skip the row mask entirely (no iota / compare / and).
        @pl.when(jnp.logical_not(is_tail))
        def _():
            accumulate(base_mask)

        # Ragged last block / phantom clamped block: row-granular mask only —
        # intra-row lane padding is already excluded by gt == 0.
        @pl.when(is_tail)
        def _():
            row_ids = lax.broadcasted_iota(jnp.int32, (tile_rows, LANE), 0)
            accumulate(base_mask & (row_ids < (rows_valid - base_row)))
    else:
        accumulate(base_mask)


def masked_loss_stats(preds, gt, maxdisp=192, compute_d1=True):
    """preds: (N, H, W) array or list of such arrays (multi-scale); gt: (N, H, W).

    Streams gt from HBM once (shared by all predictions) and returns an f32
    array of shape (P, 3): per prediction [masked count, smooth-L1 sum,
    D1 hit count] over the mask 0 < gt < maxdisp.
    """
    single = not isinstance(preds, (list, tuple))
    pred_list = [preds] if single else list(preds)
    num_preds = len(pred_list)

    gt_f = jnp.reshape(gt, (-1,))
    n = int(gt_f.shape[0])
    pred_fs = [jnp.reshape(p, (-1,)) for p in pred_list]

    # Pad only up to a lane multiple (<= 127 elems); padded gt == 0 is excluded
    # by the in-kernel mask, so nothing else is needed for it.
    rem = n % LANE
    if rem:
        pad = LANE - rem
        gt_f = jnp.pad(gt_f, (0, pad))
        pred_fs = [jnp.pad(p, (0, pad)) for p in pred_fs]
    rows = gt_f.shape[0] // LANE
    gt2 = gt_f.reshape(rows, LANE)
    preds2 = [p.reshape(rows, LANE) for p in pred_fs]

    ncores = _num_tensorcores()

    # Largest streaming tile such that (P preds + gt) x 2 pipeline buffers fit
    # the input-VMEM budget; always a sublane multiple.
    cap = INPUT_VMEM_BUDGET // ((num_preds + 1) * LANE * 4 * 2)
    cap = max(SUBLANE, (min(cap, MAX_TILE_ROWS) // SUBLANE) * SUBLANE)

    if rows <= cap:
        # Whole input is a single block: pad a handful of rows so the block's
        # sublane dim is aligned (tiny arrays only; padded gt == 0 -> excluded).
        if rows % SUBLANE:
            pad_rows = _round_up(rows, SUBLANE) - rows
            gt2 = jnp.pad(gt2, ((0, pad_rows), (0, 0)))
            preds2 = [jnp.pad(p, ((0, pad_rows), (0, 0))) for p in preds2]
            rows += pad_rows
        tile_rows = rows
    else:
        tile_rows = cap

    total_blocks = pl.cdiv(rows, tile_rows)
    steps_per_core = pl.cdiv(total_blocks, ncores)
    # Row mask is only needed when some block sticks out past `rows` (ragged
    # tail) or is a phantom duplicate of the last block (clamped index_map).
    apply_tail_mask = (ncores * steps_per_core * tile_rows) != rows
    last_block = total_blocks - 1

    def in_map(c, s):
        # Clamp phantom blocks into range; their contribution is zeroed by the
        # in-kernel row mask.
        return (jnp.minimum(c * steps_per_core + s, last_block), 0)

    kernel = functools.partial(
        _loss_stats_kernel,
        maxdisp=float(maxdisp),
        rows_valid=rows,
        tile_rows=tile_rows,
        steps_per_core=steps_per_core,
        compute_d1=compute_d1,
        apply_tail_mask=apply_tail_mask,
    )

    bytes_in = n * gt.dtype.itemsize + sum(n * p.dtype.itemsize for p in pred_list)
    out_elems = ncores * num_preds * 3 * SUBLANE * LANE
    cost = pl.CostEstimate(
        flops=(7 + (5 if compute_d1 else 0)) * n * num_preds,
        transcendentals=0,
        bytes_accessed=bytes_in + out_elems * 4,
    )

    tile_spec = pl.BlockSpec((tile_rows, LANE), in_map)

    def build(core_sem):
        return pl.pallas_call(
            kernel,
            out_shape=jax.ShapeDtypeStruct(
                (ncores, num_preds, 3, SUBLANE, LANE), jnp.float32),
            grid_spec=pltpu.PrefetchScalarGridSpec(
                num_scalar_prefetch=0,
                grid=(ncores, steps_per_core),
                in_specs=[tile_spec] * num_preds + [tile_spec],
                out_specs=pl.BlockSpec(
                    (1, num_preds, 3, SUBLANE, LANE),
                    lambda c, s: (c, 0, 0, 0, 0)),
            ),
            compiler_params=pltpu.CompilerParams(
                dimension_semantics=(core_sem, pltpu.ARBITRARY),
                vmem_limit_bytes=VMEM_LIMIT_BYTES),
            cost_estimate=cost,
        )

    args = preds2 + [gt2]
    if ncores > 1:
        try:
            out = build(pltpu.CORE_PARALLEL)(*args)
        except Exception:
            # Fallback if CORE_PARALLEL lowering is rejected on this toolchain.
            out = build(pltpu.PARALLEL)(*args)
    else:
        out = build(pltpu.ARBITRARY)(*args)

    return jnp.sum(out, axis=(0, 3, 4))   # (P, 3): count, smooth-L1 sum, D1 hits


class LossWarperPallas:
    """JAX/Pallas port of Loss_warper.forward (masked smooth-L1 + D1 metric)."""

    def __init__(self, model=None, maxdisp=192, base=32):
        self.maxdisp = maxdisp
        self.base = base
        # TODO(synk): self.model is an external stereo network (with a .Regression
        # sub-module whose set_full_shape is called in the torch source) that is not
        # defined in this module; a deterministic synthetic predictor stands in.
        self.model = model if model is not None else self._synthetic_model
        self.training = True

    def _synthetic_model(self, L, R):
        # (N, C, H, W) -> disparity (N, H, W); second output (head) is None,
        # matching the `output[1] is None` branch of the torch forward.
        pred = jnp.mean(jnp.abs(L - R), axis=1) * 30.0 + 1.0
        return (pred, None)

    def pad_img(self, L, R):
        if self.training:
            return L, R, 0, 0
        base = self.base
        bot = (-L.shape[2]) % base
        right = (-L.shape[3]) % base
        L = jnp.pad(L, ((0, 0), (0, 0), (0, bot), (0, right)))
        R = jnp.pad(R, ((0, 0), (0, 0), (0, bot), (0, right)))
        return L, R, bot, right

    def unpad_img(self, output, bot, right):
        if self.training:
            return output
        out = list(output)
        for i in range(len(out)):
            if out[i] is not None:
                if bot > 0:
                    out[i] = out[i][:, :-bot, :]
                if right > 0:
                    out[i] = out[i][:, :, :-right]
        return out

    def _masked_means(self, preds, gt2, compute_d1):
        sums = masked_loss_stats(preds, gt2, self.maxdisp, compute_d1=compute_d1)
        # Guard the empty-mask case (torch would produce NaN from an empty mean).
        denom = jnp.maximum(sums[:, 0], 1.0)
        return sums[:, 1] / denom, sums[:, 2] / denom

    def __call__(self, L, R, gt):
        L_p, R_p, bot, right = self.pad_img(L, R)
        output = self.model(L_p, R_p)
        output = self.unpad_img(output, bot, right)

        gt2 = jnp.squeeze(gt, axis=1)   # (N, H, W); mask computed in-kernel

        if output[0] is not None:
            if self.training:
                if isinstance(output[0], (list, tuple)):
                    # Fused multi-scale path: one pallas_call, gt streamed once.
                    weights = [0.5, 0.5, 0.7, 1.0]
                    scale_preds = list(output[0])[:len(weights)]
                    sl1_means, _ = self._masked_means(scale_preds, gt2,
                                                      compute_d1=False)
                    loss_disp = sum(w * sl1_means[i]
                                    for i, w in zip(range(len(scale_preds)), weights))
                else:
                    sl1_means, _ = self._masked_means(output[0], gt2,
                                                      compute_d1=False)
                    loss_disp = sl1_means[0]
            else:
                sl1_means, d1_means = self._masked_means(output[0], gt2,
                                                         compute_d1=True)
                loss_disp = [sl1_means[0], d1_means[0]]   # self.eval_losses order
        else:
            loss_disp = 0

        # TODO(synk): losses_head is referenced but never defined in the torch
        # source; output[1] is None for the synthetic model -> loss_head = 0.
        loss_head = 0
        return loss_disp, loss_head


def _ref_means(pred, gtv, maxdisp=192.0):
    """Pure-JAX reference of the masked smooth-L1 mean and D1 metric."""
    m = (gtv > 0.0) & (gtv < maxdisp)
    d = pred - gtv
    ad = jnp.abs(d)
    sl1 = jnp.where(ad < 1.0, 0.5 * d * d, ad - 0.5)
    cnt = jnp.maximum(jnp.sum(m.astype(jnp.float32)), 1.0)
    sl1_mean = jnp.sum(jnp.where(m, sl1, 0.0)) / cnt
    d1 = m & (ad > 3.0) & (ad > 0.05 * jnp.abs(gtv))
    d1_mean = jnp.sum(d1.astype(jnp.float32)) / cnt
    return sl1_mean, d1_mean


if __name__ == "__main__":
    key = jax.random.PRNGKey(0)
    k1, k2, k3 = jax.random.split(key, 3)
    N, C, H, W = 2, 3, 16, 16
    L = jax.random.uniform(k1, (N, C, H, W), jnp.float32)
    R = jax.random.uniform(k2, (N, C, H, W), jnp.float32)
    # gt disparity: values <= 0 and >= maxdisp present so the mask is exercised
    gt = jax.random.uniform(k3, (N, 1, H, W), jnp.float32, minval=-10.0, maxval=220.0)

    gtv = jnp.squeeze(gt, axis=1)
    pred_ref = jnp.mean(jnp.abs(L - R), axis=1) * 30.0 + 1.0

    warper = LossWarperPallas(maxdisp=192)

    # --- training path (single prediction): scalar smooth-L1 loss ---
    warper.training = True
    loss_disp, loss_head = warper(L, R, gt)
    jax.block_until_ready(loss_disp)
    ref_sl1, ref_d1 = _ref_means(pred_ref, gtv)
    np.testing.assert_allclose(np.asarray(loss_disp), np.asarray(ref_sl1),
                               rtol=1e-4, atol=1e-5)

    # --- eval path: pad to multiple of 32, unpad, [smooth-L1, D1] metrics ---
    warper.training = False
    eval_losses, _ = warper(L, R, gt)
    jax.block_until_ready(eval_losses[0])
    jax.block_until_ready(eval_losses[1])
    np.testing.assert_allclose(np.asarray(eval_losses[0]), np.asarray(ref_sl1),
                               rtol=1e-4, atol=1e-5)
    np.testing.assert_allclose(np.asarray(eval_losses[1]), np.asarray(ref_d1),
                               rtol=1e-4, atol=1e-5)

    # --- fused multi-scale training path (list of predictions, gt streamed once) ---
    def multi_model(Li, Ri):
        p0 = jnp.mean(jnp.abs(Li - Ri), axis=1) * 30.0 + 1.0
        return ([p0, p0 * 1.05, p0 * 0.95, p0 + 0.5], None)

    warper_ms = LossWarperPallas(model=multi_model, maxdisp=192)
    warper_ms.training = True
    loss_ms, _ = warper_ms(L, R, gt)
    jax.block_until_ready(loss_ms)
    weights = [0.5, 0.5, 0.7, 1.0]
    scale_preds = [pred_ref, pred_ref * 1.05, pred_ref * 0.95, pred_ref + 0.5]
    ref_ms = sum(w * _ref_means(p, gtv)[0] for w, p in zip(weights, scale_preds))
    np.testing.assert_allclose(np.asarray(loss_ms), np.asarray(ref_ms),
                               rtol=1e-4, atol=1e-5)

    print("KERNEL_OK")
</pallas_src>

<mosaic_0001>
module attributes {stable_mosaic.version = 11 : i64} {
  func.func @_loss_stats_kernel(%arg0: i32, %arg1: i32, %arg2: memref<8x128xf32, #tpu.memory_space<vmem>>, %arg3: memref<8x128xf32, #tpu.memory_space<vmem>>, %arg4: memref<1x1x3x8x128xf32, #tpu.memory_space<vmem>>) attributes {dimension_semantics = [#tpu.dimension_semantics<arbitrary>, #tpu.dimension_semantics<arbitrary>], iteration_bounds = array<i64: 1, 1>, scalar_prefetch = 0 : i64, scratch_operands = 0 : i64, tpu.core_type = #tpu.core_type<tc>, window_params = [{transform_indices = @transform_0, window_bounds = array<i64: 8, 128>}, {transform_indices = @transform_1, window_bounds = array<i64: 8, 128>}, {transform_indices = @transform_2, window_bounds = array<i64: 1, 1, 3, 8, 128>}]} {
    %c0_i32 = arith.constant 0 : i32
    %0 = arith.cmpi eq, %arg1, %c0_i32 : i32
    %1 = arith.extui %0 : i1 to i32
    %c0_i32_0 = arith.constant 0 : i32
    %2 = arith.cmpi ne, %1, %c0_i32_0 : i32
    scf.if %2 {
      %cst_30 = arith.constant 0.000000e+00 : f32
      %40 = vector.broadcast %cst_30 : f32 to vector<1x1x3x8x128xf32>
      %c0_31 = arith.constant 0 : index
      %c0_32 = arith.constant 0 : index
      %c0_33 = arith.constant 0 : index
      %c0_34 = arith.constant 0 : index
      %c0_35 = arith.constant 0 : index
      %41 = vector.load %arg4[%c0_31, %c0_32, %c0_33, %c0_34, %c0_35] : memref<1x1x3x8x128xf32, #tpu.memory_space<vmem>>, vector<1x1x3x8x128xf32>
      tpu.vector_store %arg4[%c0_31, %c0_32, %c0_33, %c0_34, %c0_35], %40 {strides = array<i32>} : memref<1x1x3x8x128xf32, #tpu.memory_space<vmem>>, vector<1x1x3x8x128xf32>,
    } else {
    }
    %c0 = arith.constant 0 : index
    %c0_1 = arith.constant 0 : index
    %3 = vector.load %arg3[%c0, %c0_1] : memref<8x128xf32, #tpu.memory_space<vmem>>, vector<8x128xf32>
    %cst = arith.constant 0.000000e+00 : f32
    %4 = vector.broadcast %cst : f32 to vector<8x128xf32>
    %5 = arith.cmpf ogt, %3, %4 : vector<8x128xf32>
    %cst_2 = arith.constant 1.920000e+02 : f32
    %6 = vector.broadcast %cst_2 : f32 to vector<8x128xf32>
    %7 = arith.cmpf olt, %3, %6 : vector<8x128xf32>
    %8 = arith.andi %5, %7 : vector<8x128xi1>
    %9 = arith.extui %8 : vector<8x128xi1> to vector<8x128xi32>
    %10 = arith.sitofp %9 : vector<8x128xi32> to vector<8x128xf32>
    %11 = vector.shape_cast %10 : vector<8x128xf32> to vector<1x8x128xf32>
    %cst_3 = arith.constant dense<0.000000e+00> : vector<8x128xf32>
    %12 = vector.multi_reduction <add>, %11, %cst_3 [0] : vector<1x8x128xf32> to vector<8x128xf32>
    %c0_4 = arith.constant 0 : index
    %c0_5 = arith.constant 0 : index
    %13 = vector.load %arg2[%c0_4, %c0_5] : memref<8x128xf32, #tpu.memory_space<vmem>>, vector<8x128xf32>
    %14 = arith.subf %13, %3 : vector<8x128xf32>
    %15 = math.absf %14 : vector<8x128xf32>
    %cst_6 = arith.constant 1.000000e+00 : f32
    %16 = vector.broadcast %cst_6 : f32 to vector<8x128xf32>
    %17 = arith.cmpf olt, %15, %16 : vector<8x128xf32>
    %cst_7 = arith.constant 5.000000e-01 : f32
    %18 = vector.broadcast %cst_7 : f32 to vector<8x128xf32>
    %19 = arith.mulf %18, %14 : vector<8x128xf32>
    %20 = arith.mulf %19, %14 : vector<8x128xf32>
    %cst_8 = arith.constant 5.000000e-01 : f32
    %21 = vector.broadcast %cst_8 : f32 to vector<8x128xf32>
    %22 = arith.subf %15, %21 : vector<8x128xf32>
    %23 = arith.select %17, %20, %22 : vector<8x128xi1>, vector<8x128xf32>
    %c0_9 = arith.constant 0 : index
    %c0_10 = arith.constant 0 : index
    %c0_11 = arith.constant 0 : index
    %c0_12 = arith.constant 0 : index
    %c0_13 = arith.constant 0 : index
    %24 = vector.load %arg4[%c0_9, %c0_10, %c0_11, %c0_12, %c0_13] : memref<1x1x3x8x128xf32, #tpu.memory_space<vmem>>, vector<1x1x1x8x128xf32>
    %25 = vector.shape_cast %24 : vector<1x1x1x8x128xf32> to vector<8x128xf32>
    %26 = arith.addf %25, %12 : vector<8x128xf32>
    %c0_14 = arith.constant 0 : index
    %c0_15 = arith.constant 0 : index
    %c0_16 = arith.constant 0 : index
    %c0_17 = arith.constant 0 : index
    %c0_18 = arith.constant 0 : index
    %27 = vector.load %arg4[%c0_14, %c0_15, %c0_16, %c0_17, %c0_18] : memref<1x1x3x8x128xf32, #tpu.memory_space<vmem>>, vector<1x1x1x8x128xf32>
    %28 = vector.shape_cast %27 : vector<1x1x1x8x128xf32> to vector<8x128xf32>
    %29 = vector.shape_cast %26 : vector<8x128xf32> to vector<1x1x1x8x128xf32>
    tpu.vector_store %arg4[%c0_14, %c0_15, %c0_16, %c0_17, %c0_18], %29 {strides = array<i32>} : memref<1x1x3x8x128xf32, #tpu.memory_space<vmem>>, vector<1x1x1x8x128xf32>,
    %c0_19 = arith.constant 0 : index
    %c0_20 = arith.constant 0 : index
    %c1 = arith.constant 1 : index
    %c0_21 = arith.constant 0 : index
    %c0_22 = arith.constant 0 : index
    %30 = vector.load %arg4[%c0_19, %c0_20, %c1, %c0_21, %c0_22] : memref<1x1x3x8x128xf32, #tpu.memory_space<vmem>>, vector<1x1x1x8x128xf32>
    %31 = vector.shape_cast %30 : vector<1x1x1x8x128xf32> to vector<8x128xf32>
    %cst_23 = arith.constant 0.000000e+00 : f32
    %32 = vector.broadcast %cst_23 : f32 to vector<8x128xf32>
    %33 = arith.select %8, %23, %32 : vector<8x128xi1>, vector<8x128xf32>
    %34 = vector.shape_cast %33 : vector<8x128xf32> to vector<1x8x128xf32>
    %cst_24 = arith.constant dense<0.000000e+00> : vector<8x128xf32>
    %35 = vector.multi_reduction <add>, %34, %cst_24 [0] : vector<1x8x128xf32> to vector<8x128xf32>
    %36 = arith.addf %31, %35 : vector<8x128xf32>
    %c0_25 = arith.constant 0 : index
    %c0_26 = arith.constant 0 : index
    %c1_27 = arith.constant 1 : index
    %c0_28 = arith.constant 0 : index
    %c0_29 = arith.constant 0 : index
    %37 = vector.load %arg4[%c0_25, %c0_26, %c1_27, %c0_28, %c0_29] : memref<1x1x3x8x128xf32, #tpu.memory_space<vmem>>, vector<1x1x1x8x128xf32>
    %38 = vector.shape_cast %37 : vector<1x1x1x8x128xf32> to vector<8x128xf32>
    %39 = vector.shape_cast %36 : vector<8x128xf32> to vector<1x1x1x8x128xf32>
    tpu.vector_store %arg4[%c0_25, %c0_26, %c1_27, %c0_28, %c0_29], %39 {strides = array<i32>} : memref<1x1x3x8x128xf32, #tpu.memory_space<vmem>>, vector<1x1x1x8x128xf32>,
    return
  }
  func.func @transform_0(%arg0: i32, %arg1: i32) -> (i32, i32) {
    %c1_i32 = arith.constant 1 : i32
    %0 = arith.muli %arg0, %c1_i32 : i32
    %1 = arith.addi %0, %arg1 : i32
    %c0_i32 = arith.constant 0 : i32
    %2 = arith.minsi %1, %c0_i32 : i32
    %c0_i32_0 = arith.constant 0 : i32
    %c0_i32_1 = arith.constant 0 : i32
    return %2, %c0_i32_0 : i32, i32
  }
  func.func @transform_1(%arg0: i32, %arg1: i32) -> (i32, i32) {
    %c1_i32 = arith.constant 1 : i32
    %0 = arith.muli %arg0, %c1_i32 : i32
    %1 = arith.addi %0, %arg1 : i32
    %c0_i32 = arith.constant 0 : i32
    %2 = arith.minsi %1, %c0_i32 : i32
    %c0_i32_0 = arith.constant 0 : i32
    %c0_i32_1 = arith.constant 0 : i32
    return %2, %c0_i32_0 : i32, i32
  }
  func.func @transform_2(%arg0: i32, %arg1: i32) -> (i32, i32, i32, i32, i32) {
    %c0_i32 = arith.constant 0 : i32
    %c0_i32_0 = arith.constant 0 : i32
    %c0_i32_1 = arith.constant 0 : i32
    %c0_i32_2 = arith.constant 0 : i32
    %c0_i32_3 = arith.constant 0 : i32
    return %arg0, %c0_i32, %c0_i32_0, %c0_i32_1, %c0_i32_2 : i32, i32, i32, i32, i32
  }
}

</mosaic_0001>

<bundles_post_ra>
// kernel: tpu_custom_call.1
= control target key start
LH: loop header
LB: loop body
LE: loop exit
PB: predicated region body
PF: predicated region fallthrough
CT: control target
= control target key end

     0   :  { %7 = vsyncpa [#allocation3], 0  ;;  %s242_s0 = inlined_call_operand.hbm [shape: f32[8,128], index: 0, kind: input, shape index: {}]   ;;  %s243_s1 = inlined_call_operand.hbm [shape: f32[8,128], index: 1, kind: input, shape index: {}]   ;;  %s244_s2 = inlined_call_operand.hbm [shape: f32[1,1,3,8,128], index: 2, kind: output, shape index: {}]  }
   0x1   :  { %8 = vsyncpa [#allocation6], 0 }
   0x2   :  { %9 = vsyncpa [#allocation4], 0  ;;  %s185_s9 = smov [#allocation2]   ;;  %s186_s11 = smov [#allocation5]  }
   0x3   :  { %s21_s10 = sshll.u32 %s185_s9, 4  ;;  %s36_s12 = sshll.u32 %s186_s11, 4  ;;  %s22_s10 = int_to_ptr.vmem [resolvable:$true] %s21_s10  ;;  %s37_s12 = int_to_ptr.vmem [resolvable:$true] %s36_s12 }
   0x4   :  { %s113_s15 = scalar_lea.hbm %s242_s0, 128 }
   0x5   :  { %p114_p0 = scmp.ne.s32.totalorder %s242_s0, %s113_s15  ;;  %p117_p1 = scmp.lt.u32.totalorder %s113_s15, %s242_s0 }
   0x7   :  { %p119_p2 = pnand %p117_p1, %p114_p0 }
   0x9   :  { %122 = shalt.err (!%p119_p2)
}
   0xa   :  { %s123_s20 = scalar_lea.vmem %s22_s10, 128  ;;  %p128_p4 = scmp.lt.s32.totalorder %s22_s10, %s22_s10 }
   0xb   :  { %p124_p3 = scmp.ne.s32.totalorder %s22_s10, %s123_s20  ;;  %p129_p5 = scmp.lt.s32.totalorder %s123_s20, %s123_s20 }
   0xd   :  { %p130_p6 = por %p129_p5, %p128_p4 }
   0xf   :  { %p131_p7 = pnand %p130_p6, %p124_p3 }
  0x11   :  { %134 = shalt.err (!%p131_p7)
}
  0x12   :  { %24 = dma.hbm_to_vmem [thread:$0]  %s242_s0, 128, %s22_s10, [#allocation3]  }
  0x13   :  { %s135_s25 = scalar_lea.hbm %s243_s1, 128 }
  0x14   :  { %p136_p8 = scmp.ne.s32.totalorder %s243_s1, %s135_s25  ;;  %p139_p9 = scmp.lt.u32.totalorder %s135_s25, %s243_s1 }
  0x16   :  { %p141_p10 = pnand %p139_p9, %p136_p8 }
  0x18   :  { %144 = shalt.err (!%p141_p10)
}
  0x19   :  { %s145_s30 = scalar_lea.vmem %s37_s12, 128  ;;  %p150_p12 = scmp.lt.s32.totalorder %s37_s12, %s37_s12 }
  0x1a   :  { %p146_p11 = scmp.ne.s32.totalorder %s37_s12, %s145_s30  ;;  %p151_p13 = scmp.lt.s32.totalorder %s145_s30, %s145_s30 }
  0x1c   :  { %p152_p0 = por %p151_p13, %p150_p12 }
  0x1e   :  { %p153_p1 = pnand %p152_p0, %p146_p11 }
  0x20   :  { %156 = shalt.err (!%p153_p1)
}
  0x21   :  { %39 = dma.hbm_to_vmem [thread:$0]  %s243_s1, 128, %s37_s12, [#allocation6]  }
  0x22   :  { %179 = dma.done.wait [#allocation3], 128  }
  0x23   :  { %180 = vsyncadd [#allocation3], 4294967168 }
  0x24   :  { %181 = dma.done.wait [#allocation6], 128  }
  0x25   :  { %182 = vsyncadd [#allocation6], 4294967168  ;;  %v187_v0 = vmov 0.0   ;;  %v59_v1 = vld [vmem:[#allocation5] sm:$0xff]  ;;  %v66_v2 = vld [vmem:[#allocation2] sm:$0xff]  ;;  %s188_s1 = smov [#allocation7]  }
  0x26   :  { %58 = vst [vmem:[#allocation7 + $0x10] sm:$0xff] %v187_v0  ;;  %vm60_vm0 = vcmp.gt.f32.partialorder %v59_v1, 0.0  ;;  %vm61_vm1 = vcmp.lt.f32.partialorder %v59_v1, 192.0  ;;  %v67_v3 = vsub.f32 %v66_v2, %v59_v1  ;;  %s88_s4 = sshll.u32 %s188_s1, 4  ;;  %s89_s4 = int_to_ptr.vmem [resolvable:$true] %s88_s4 }
  0x27   :  { %vm62_vm2 = vmand %vm60_vm0, %vm61_vm1  ;;  %s157_s5 = scalar_lea.vmem %s89_s4, 384  ;;  %p162_p3 = scmp.lt.s32.totalorder %s89_s4, %s89_s4 }
  0x28   :  { %v105_v4 = vsel %vm62_vm2, 1.0, %v187_v0  ;;  %v68_v5 = vand.u32 2147483647, %v67_v3  ;;  %v70_v6 = vmul.f32 0.5, %v67_v3  ;;  %p158_p2 = scmp.ne.s32.totalorder %s89_s4, %s157_s5  ;;  %p163_p4 = scmp.lt.s32.totalorder %s157_s5, %s157_s5 }
  0x29   :  { %76 = vst [vmem:[#allocation7] sm:$0xff] %v105_v4 }
  0x2a   :  { %vm69_vm3 = vcmp.lt.f32.partialorder %v68_v5, 1.0  ;;  %v71_v7 = vmul.f32 %v70_v6, %v67_v3  ;;  %v106_v8 = vadd.f32 -0.5, %v68_v5  ;;  %p164_p5 = por %p163_p4, %p162_p3 }
  0x2c   :  { %v73_v9 = vsel %vm69_vm3, %v71_v7, %v106_v8  ;;  %p165_p6 = pnand %p164_p5, %p158_p2 }
  0x2d   :  { %v79_v10 = vsel %vm62_vm2, %v73_v9, 0.0 }
  0x2e   :  { %82 = vst [vmem:[#allocation7 + $0x8] sm:$0xff] %v79_v10 }
  0x2f   :  { %168 = shalt.err (!%p165_p6)
}
  0x30   :  { %s169_s8 = scalar_lea.hbm %s244_s2, 384 }
  0x31   :  { %p170_p7 = scmp.ne.s32.totalorder %s244_s2, %s169_s8  ;;  %p173_p8 = scmp.lt.u32.totalorder %s169_s8, %s244_s2 }
  0x33   :  { %p175_p9 = pnand %p173_p8, %p170_p7 }
  0x35   :  { %178 = shalt.err (!%p175_p9)
}
  0x36   :  { %s189_s13 = smov 128   ;;  %s190_s14 = smov 8  }
  0x37   :  { %94 = dma.vmem_to_hbm [thread:$0]  %s89_s4, 384, %s244_s2, [#allocation4], %s189_s13, %s189_s13, %s190_s14  }
  0x38   :  { %183 = dma.done.wait [#allocation4], 384  }
  0x39   :  { %184 = vsyncadd [#allocation4], 4294966912 }
  0x3a   :  { %98 = vsyncpa [#allocation3], 1 }
  0x3b   :  { %99 = vsyncpa [#allocation6], 1 }
  0x3c   :  { %100 = vsyncpa [#allocation4], 1 }

</bundles_post_ra>
